<compile_context>
chip_gen: v7x
topology: tpu7x:2x2x1
jax: 0.10.0
libtpu: 0.0.40
codegen_flags: <defaults>
</compile_context>

<pallas_src>
import jax
import jax.numpy as jnp
from jax.experimental import pallas as pl
from jax.experimental.pallas import tpu as pltpu

_LANE = 128
_COL_CANDIDATES = (8192, 4096, 2048, 1024, 512, 256, 128)  # widest first
_MAX_TILE_BYTES = 4 * 1024 * 1024       # per-tile budget; 4x fits v7x/v5e easily
_VMEM_LIMIT_BYTES = 32 * 1024 * 1024    # explicit scoped-VMEM budget (safe on all gens)


def _copy_kernel(x_ref, o_ref):
    # Identity copy of the current tile (full-width, unmasked vector stores).
    o_ref[...] = x_ref[...]


def _sublane_multiple(dtype):
    """Packed-sublane multiple for the dtype (8 for 4B, 16 for 2B, 32 for 1B)."""
    itemsize = jnp.dtype(dtype).itemsize
    if itemsize >= 4:
        return 8
    if itemsize == 2:
        return 16
    return 32


def _choose_2d_layout(total):
    """Lane-dense (rows, cols) factorization, or None if none exists."""
    if total % _LANE != 0:
        return None
    for c in _COL_CANDIDATES:
        if total % c == 0:
            return total // c, c
    return None


def _choose_tile_rows(rows, cols, dtype):
    """Largest tile_rows <= VMEM budget; prefer an exact divisor of rows."""
    sublane = _sublane_multiple(dtype)
    bytes_per_row = cols * jnp.dtype(dtype).itemsize
    max_rows = max(sublane, _MAX_TILE_BYTES // max(bytes_per_row, 1))
    if rows <= max_rows:
        return rows  # single full-extent block (no (8,128) constraint applies)
    # Prefer a sublane-aligned divisor of rows so the last block is not partial.
    best = None
    t = sublane
    while t <= max_rows:
        if rows % t == 0:
            best = t
        t += sublane
    if best is not None:
        return best
    # Fallback: sublane-aligned, possibly one partial (masked) final block.
    return max(sublane, (max_rows // sublane) * sublane)


def _pallas_identity_copy(x):
    """Copy `x` through a Pallas kernel using a lane-dense 2D tiling.

    Returns None if no lane-dense layout exists (caller falls back to the
    zero-copy path).
    """
    total = x.size
    if total == 0:
        return None
    layout = _choose_2d_layout(total)
    if layout is None:
        return None  # never emit a (1, total) block; skip the kernel instead

    rows, cols = layout
    flat = x.reshape(rows, cols)
    tile_rows = _choose_tile_rows(rows, cols, flat.dtype)
    grid = (pl.cdiv(rows, tile_rows),)

    out = pl.pallas_call(
        _copy_kernel,
        out_shape=jax.ShapeDtypeStruct(flat.shape, flat.dtype),
        grid=grid,
        in_specs=[pl.BlockSpec((tile_rows, cols), lambda i: (i, 0))],
        out_specs=pl.BlockSpec((tile_rows, cols), lambda i: (i, 0)),
        cost_estimate=pl.CostEstimate(
            flops=0, transcendentals=0, bytes_accessed=2 * flat.nbytes),
        compiler_params=pltpu.CompilerParams(
            dimension_semantics=("parallel",),
            vmem_limit_bytes=_VMEM_LIMIT_BYTES,
        ),
    )(flat)
    return out.reshape(x.shape)


def unsqueeze(x, dim, *, exercise_kernel=False):
    """Equivalent of torch.Tensor.unsqueeze(dim).

    Default path is pure metadata (jnp.expand_dims, zero bytes moved), which
    is the optimum on every TPU generation.  `exercise_kernel=True` routes the
    data through a tuned Pallas identity-copy kernel first (for testing).
    """
    ndim = x.ndim
    # torch allows dim in [-ndim-1, ndim]; jnp.expand_dims matches this range.
    if not (-(ndim + 1) <= dim <= ndim):
        raise ValueError(f"dim {dim} out of range for input with {ndim} dims")
    if exercise_kernel:
        y = _pallas_identity_copy(x)
        if y is not None:
            return jnp.expand_dims(y, dim)
    return jnp.expand_dims(x, dim)  # zero-cost metadata axis insertion


if __name__ == "__main__":
    key = jax.random.PRNGKey(0)
    # Small NCHW input consistent with typical module usage (Unsqueeze(dim=1)).
    x = jax.random.normal(key, (2, 4, 16, 16), dtype=jnp.float32)
    dim = 1

    # Fast (production) path: pure metadata op.
    out_fast = jax.block_until_ready(unsqueeze(x, dim))
    ref = jnp.expand_dims(x, dim)
    assert out_fast.shape == (2, 1, 4, 16, 16), out_fast.shape
    assert out_fast.dtype == x.dtype
    assert bool(jnp.array_equal(out_fast, ref))

    # Kernel path: exercises the Pallas identity copy once on TPU.
    out_kernel = jax.block_until_ready(unsqueeze(x, dim, exercise_kernel=True))
    assert out_kernel.shape == (2, 1, 4, 16, 16), out_kernel.shape
    assert bool(jnp.array_equal(out_kernel, ref))

    # Negative dim (torch semantics).
    out_neg = jax.block_until_ready(unsqueeze(x, -1, exercise_kernel=True))
    assert out_neg.shape == (2, 4, 16, 16, 1), out_neg.shape
    assert bool(jnp.array_equal(out_neg, jnp.expand_dims(x, -1)))

    # bf16 input exercises the dtype-aware sublane handling.
    xb = x.astype(jnp.bfloat16)
    out_bf16 = jax.block_until_ready(unsqueeze(xb, 0, exercise_kernel=True))
    assert out_bf16.shape == (1, 2, 4, 16, 16), out_bf16.shape
    assert out_bf16.dtype == jnp.bfloat16
    assert bool(jnp.array_equal(out_bf16, jnp.expand_dims(xb, 0)))

    print("KERNEL_OK")
</pallas_src>

<mosaic_0001>
module attributes {stable_mosaic.version = 11 : i64} {
  func.func @_copy_kernel(%arg0: i32, %arg1: memref<1x2048xf32, #tpu.memory_space<vmem>>, %arg2: memref<1x2048xf32, #tpu.memory_space<vmem>>) attributes {dimension_semantics = [#tpu.dimension_semantics<parallel>], iteration_bounds = array<i64: 1>, scalar_prefetch = 0 : i64, scratch_operands = 0 : i64, tpu.core_type = #tpu.core_type<tc>, window_params = [{transform_indices = @transform_0, window_bounds = array<i64: 1, 2048>}, {transform_indices = @transform_1, window_bounds = array<i64: 1, 2048>}]} {
    %c0 = arith.constant 0 : index
    %c0_0 = arith.constant 0 : index
    %0 = vector.load %arg1[%c0, %c0_0] : memref<1x2048xf32, #tpu.memory_space<vmem>>, vector<1x2048xf32>
    %c0_1 = arith.constant 0 : index
    %c0_2 = arith.constant 0 : index
    %1 = vector.load %arg2[%c0_1, %c0_2] : memref<1x2048xf32, #tpu.memory_space<vmem>>, vector<1x2048xf32>
    tpu.vector_store %arg2[%c0_1, %c0_2], %0 {strides = array<i32>} : memref<1x2048xf32, #tpu.memory_space<vmem>>, vector<1x2048xf32>,
    return
  }
  func.func @transform_0(%arg0: i32) -> (i32, i32) {
    %c0_i32 = arith.constant 0 : i32
    %c0_i32_0 = arith.constant 0 : i32
    return %arg0, %c0_i32 : i32, i32
  }
  func.func @transform_1(%arg0: i32) -> (i32, i32) {
    %c0_i32 = arith.constant 0 : i32
    %c0_i32_0 = arith.constant 0 : i32
    return %arg0, %c0_i32 : i32, i32
  }
}

</mosaic_0001>

<bundles_post_ra>
// kernel: tpu_custom_call.1
= control target key start
LH: loop header
LB: loop body
LE: loop exit
PB: predicated region body
PF: predicated region fallthrough
CT: control target
= control target key end

     0   :  { %6 = vsyncpa [#allocation3], 0  ;;  %s126_s0 = inlined_call_operand.hbm [shape: f32[1,2048], index: 0, kind: input, shape index: {}]   ;;  %s127_s1 = inlined_call_operand.hbm [shape: f32[1,2048], index: 1, kind: output, shape index: {}]  }
   0x1   :  { %7 = vsyncpa [#allocation4], 0  ;;  %s90_s6 = smov [#allocation2]   ;;  %s42_s10 = scalar_lea.hbm %s126_s0, 256 }
   0x2   :  { %s14_s7 = sshll.u32 %s90_s6, 4  ;;  %p43_p0 = scmp.ne.s32.totalorder %s126_s0, %s42_s10  ;;  %s15_s7 = int_to_ptr.vmem [resolvable:$true] %s14_s7 }
   0x3   :  { %p46_p1 = scmp.lt.u32.totalorder %s42_s10, %s126_s0 }
   0x5   :  { %p48_p2 = pnand %p46_p1, %p43_p0 }
   0x7   :  { %51 = shalt.err (!%p48_p2)
}
   0x8   :  { %s52_s15 = scalar_lea.vmem %s15_s7, 256  ;;  %p57_p4 = scmp.lt.s32.totalorder %s15_s7, %s15_s7 }
   0x9   :  { %p53_p3 = scmp.ne.s32.totalorder %s15_s7, %s52_s15  ;;  %p58_p5 = scmp.lt.s32.totalorder %s52_s15, %s52_s15 }
   0xb   :  { %p59_p6 = por %p58_p5, %p57_p4 }
   0xd   :  { %p60_p7 = pnand %p59_p6, %p53_p3 }
   0xf   :  { %63 = shalt.err (!%p60_p7)
}
  0x10   :  { %17 = dma.hbm_to_vmem [thread:$0]  %s126_s0, 256, %s15_s7, [#allocation3]  }
  0x11   :  { %86 = dma.done.wait [#allocation3], 256  }
  0x12   :  { %87 = vsyncadd [#allocation3], 4294967040  ;;  %s91_s18 = smov [#allocation5]   ;;  %v21_v0 = vld [vmem:[#allocation2] sm:$0xff]  ;;  %v22_v1 = vld [vmem:[#allocation2 + $0x8] sm:$0xff] }
  0x13   :  { %s31_s19 = sshll.u32 %s91_s18, 4  ;;  %23 = vst [vmem:[#allocation5] sm:$0xff] %v21_v0  ;;  %24 = vst [vmem:[#allocation5 + $0x8] sm:$0xff] %v22_v1  ;;  %s32_s19 = int_to_ptr.vmem [resolvable:$true] %s31_s19 }
  0x14   :  { %s64_s20 = scalar_lea.vmem %s32_s19, 256  ;;  %p69_p9 = scmp.lt.s32.totalorder %s32_s19, %s32_s19 }
  0x15   :  { %p65_p8 = scmp.ne.s32.totalorder %s32_s19, %s64_s20  ;;  %p70_p10 = scmp.lt.s32.totalorder %s64_s20, %s64_s20 }
  0x17   :  { %p71_p11 = por %p70_p10, %p69_p9 }
  0x19   :  { %p72_p12 = pnand %p71_p11, %p65_p8 }
  0x1b   :  { %75 = shalt.err (!%p72_p12)
}
  0x1c   :  { %s76_s0 = scalar_lea.hbm %s127_s1, 256 }
  0x1d   :  { %p77_p13 = scmp.ne.s32.totalorder %s127_s1, %s76_s0  ;;  %p80_p0 = scmp.lt.u32.totalorder %s76_s0, %s127_s1 }
  0x1f   :  { %p82_p1 = pnand %p80_p0, %p77_p13 }
  0x21   :  { %85 = shalt.err (!%p82_p1)
}
  0x22   :  { %34 = dma.vmem_to_hbm [thread:$0]  %s32_s19, 256, %s127_s1, [#allocation4]  }
  0x23   :  { %88 = dma.done.wait [#allocation4], 256  }
  0x24   :  { %89 = vsyncadd [#allocation4], 4294967040 }
  0x25   :  { %38 = vsyncpa [#allocation3], 1 }
  0x26   :  { %39 = vsyncpa [#allocation4], 1 }

</bundles_post_ra>
